<compile_context>
chip_gen: v6e
topology: v6e:2x2x1
jax: 0.10.0
libtpu: 0.0.40
codegen_flags: <defaults>
</compile_context>

<pallas_src>
import functools
import math

import jax
import jax.numpy as jnp
from jax import lax
from jax.experimental import pallas as pl
from jax.experimental.pallas import tpu as pltpu


def _round_up(x: int, m: int) -> int:
    return ((x + m - 1) // m) * m


def _vmem_capacity_bytes() -> int:
    try:
        return int(pltpu.get_tpu_info().vmem_capacity_bytes)
    except Exception:
        return 64 * 1024 * 1024  # conservative fallback (v7x floor)


# ---------------------------------------------------------------------------
# Pass 1: streamed per-split partial Gram + column sums.
# grid = (num_splits, tiles_per_split); splits axis is "parallel" (one partial
# accumulator per TensorCore on v7x), tile axis is the reduction ("arbitrary").
# The output blocks themselves are the accumulators (resident across tiles).
# ---------------------------------------------------------------------------
def _partial_gram_kernel(x_ref, shift_ref, gram_ref, msum_ref, *,
                         n_total, tile_rows, tiles_per_split):
    t = pl.program_id(1)

    @pl.when(t == 0)
    def _init():
        gram_ref[...] = jnp.zeros_like(gram_ref)
        msum_ref[...] = jnp.zeros_like(msum_ref)

    # Mask rows past the true N (boundary / phantom tiles contribute zero).
    row0 = (pl.program_id(0) * tiles_per_split + t) * tile_rows
    rows = lax.broadcasted_iota(jnp.int32, (tile_rows, 1), 0) + row0
    valid = rows < n_total

    # Coarse-shifted, masked tile; bf16 only for the MXU push (f32 accumulate).
    xc = jnp.where(valid, x_ref[...].astype(jnp.float32) - shift_ref[...], 0.0)
    xb = xc.astype(jnp.bfloat16)
    gram_ref[...] += lax.dot_general(xb, xb, (((0,), (0,)), ((), ())),
                                     preferred_element_type=jnp.float32)
    msum_ref[...] += jnp.sum(xc, axis=0, keepdims=True)


# ---------------------------------------------------------------------------
# Combine partial Grams + power iteration -> top principal direction v (1, D).
# Tiny (runs once on whole-array VMEM blocks).
# ---------------------------------------------------------------------------
def _combine_power_kernel(gram_ref, msum_ref, v_ref, *, n_total, niter):
    s = jnp.sum(gram_ref[...], axis=0)            # (D, D)
    m = jnp.sum(msum_ref[...], axis=0)            # (1, D)
    n = jnp.float32(n_total)
    mean = m * (1.0 / n)
    # Centered-Gram identity on the coarse-shifted data:
    #   C = sum xc xc^T - N * mean_c mean_c^T   (exactly the data covariance).
    c = s - n * lax.dot_general(mean, mean, (((0,), (0,)), ((), ())),
                                preferred_element_type=jnp.float32)

    d = c.shape[0]
    # Fixed pseudo-random init (an all-ones v0 can be ~orthogonal to the top
    # eigenvector for adversarial data).
    idx = lax.broadcasted_iota(jnp.float32, (1, d), 1)
    v = jnp.cos(idx * 1.2345) + 1.1
    v = v * lax.rsqrt(jnp.sum(v * v))
    # TODO(synk): torch.pca_lowrank uses a *randomized* range finder; this
    # deterministic power iteration converges to the same top-1 subspace
    # (up to the inherent sign ambiguity of a singular vector).
    for _ in range(niter):                        # fully unrolled
        w = lax.dot_general(v, c, (((1,), (0,)), ((), ())),
                            preferred_element_type=jnp.float32)
        v = w * lax.rsqrt(jnp.sum(w * w) + 1e-30)

    # Sign convention: make the largest-|component| of v positive.
    # (Ties at +/-amax sum to 0 -> defaults to +1; benign.)
    amax = jnp.max(jnp.abs(v))
    picked = jnp.sum(jnp.where(jnp.abs(v) >= amax, v, 0.0))
    v = v * jnp.where(picked < 0.0, jnp.float32(-1.0), jnp.float32(1.0))
    v_ref[...] = v


# ---------------------------------------------------------------------------
# Pass 2: lane-dense projection u[0, rows] = v . (X[rows] - shift)^T.
# Output is a (1, N) slab; per-step lane width is a multiple of 128 (or N).
# (The constant shift.v offset is irrelevant: min/max rescale cancels it.)
# ---------------------------------------------------------------------------
def _project_kernel(x_ref, v_ref, shift_ref, u_ref):
    xc = (x_ref[...].astype(jnp.float32) - shift_ref[...]).astype(jnp.bfloat16)
    vb = v_ref[...].astype(jnp.bfloat16)
    u_ref[...] = lax.dot_general(vb, xc, (((1,), (1,)), ((), ())),
                                 preferred_element_type=jnp.float32)  # (1, T)


# ---------------------------------------------------------------------------
# Pass 3: global min/max rescale, threshold, per-patch label select (tiny).
# ---------------------------------------------------------------------------
def _label_kernel(u_ref, y_ref, out_ref, *, threshold, bg_class, use_ge):
    u = u_ref[...]                                # (1, N) f32
    umin = jnp.min(u)
    umax = jnp.max(u)
    denom = umax - umin
    # Guard the degenerate constant-projection case (reference would emit NaN).
    denom = jnp.where(denom > 0.0, denom, jnp.float32(1.0))
    scaled = (u - umin) / denom
    thr = jnp.float32(threshold)
    cond = (scaled >= thr) if use_ge else (scaled <= thr)
    out_ref[...] = jnp.where(cond, y_ref[...], jnp.int32(bg_class))


def pca_forward(x, y, *, compare_fn="le", threshold=0.5, n_components=1,
                bg_class=200, niter=10):
    """JAX/Pallas equivalent of PCA.forward(x, y).

    x: (B, n_patches, dim) float, n_patches must be a perfect square.
    y: (B,) integer image-level labels.
    returns: (B, H, W) int32 pseudo patch labels.
    """
    assert n_components == 1, "reshape to (B, H, W) in the reference implies q == 1"
    B, n_patches, dim = x.shape
    H = W = int(math.isqrt(n_patches))
    assert H * W == n_patches, "n_patches must be a perfect square"
    N = B * n_patches

    # Stream x in its native dtype (no standalone bf16 cast = no extra HBM pass).
    x2d = x.reshape(N, dim)
    # Coarse f32 per-column shift from a small leading slice (tiny HBM read);
    # stabilizes the one-pass centered-Gram identity. Exact: covariance and the
    # min/max rescale are both shift-invariant.
    shift = jnp.mean(x2d[: min(N, 1024)].astype(jnp.float32), axis=0, keepdims=True)
    # Per-patch image label row (patch n belongs to image n // n_patches).
    y_row = jnp.repeat(y.astype(jnp.int32), n_patches).reshape(1, N)

    # ---- per-generation tiling / VMEM plan ---------------------------------
    cap = _vmem_capacity_bytes()
    vmem_limit = (96 << 20) if cap >= (100 << 20) else (44 << 20)
    gram_bytes = dim * dim * 4
    budget = max(vmem_limit - 2 * gram_bytes - (2 << 20), 2 * 8 * dim * 4)
    tile_rows = int(min(2048, max(8, (budget // (2 * dim * 4)) // 8 * 8)))
    # Never use more rows per tile than one split needs (keeps 2 splits busy).
    tile_rows = max(8, min(tile_rows, _round_up(pl.cdiv(N, 2), 8)))
    num_tiles = pl.cdiv(N, tile_rows)
    num_splits = 2 if num_tiles >= 2 else 1       # v7x: one partial Gram per TC
    tiles_per_split = pl.cdiv(num_tiles, num_splits)
    last_block = num_tiles - 1                    # clamp phantom steps in-bounds

    # ---- pass 1: per-split partial Gram + column sums -----------------------
    gram_parts, sum_parts = pl.pallas_call(
        functools.partial(_partial_gram_kernel, n_total=N,
                          tile_rows=tile_rows, tiles_per_split=tiles_per_split),
        out_shape=(jax.ShapeDtypeStruct((num_splits, dim, dim), jnp.float32),
                   jax.ShapeDtypeStruct((num_splits, 1, dim), jnp.float32)),
        grid_spec=pltpu.PrefetchScalarGridSpec(
            num_scalar_prefetch=0,
            grid=(num_splits, tiles_per_split),
            in_specs=[
                pl.BlockSpec(
                    (tile_rows, dim),
                    lambda s, t: (jnp.minimum(s * tiles_per_split + t, last_block), 0)),
                pl.BlockSpec((1, dim), lambda s, t: (0, 0)),
            ],
            out_specs=(
                pl.BlockSpec((None, dim, dim), lambda s, t: (s, 0, 0)),
                pl.BlockSpec((None, 1, dim), lambda s, t: (s, 0, 0)),
            )),
        compiler_params=pltpu.CompilerParams(
            dimension_semantics=("parallel", "arbitrary"),
            vmem_limit_bytes=vmem_limit),
    )(x2d, shift)

    # ---- combine partials + power iteration -> v (1, D) ---------------------
    v = pl.pallas_call(
        functools.partial(_combine_power_kernel, n_total=float(N), niter=int(niter)),
        out_shape=jax.ShapeDtypeStruct((1, dim), jnp.float32),
        in_specs=[pl.BlockSpec(memory_space=pltpu.MemorySpace.VMEM),
                  pl.BlockSpec(memory_space=pltpu.MemorySpace.VMEM)],
        out_specs=pl.BlockSpec(memory_space=pltpu.MemorySpace.VMEM),
        compiler_params=pltpu.CompilerParams(vmem_limit_bytes=vmem_limit),
    )(gram_parts, sum_parts)

    # ---- pass 2: lane-dense projection u = v . (X - shift)^T ----------------
    proj_budget = max(vmem_limit - (2 << 20), 2 * 128 * (dim * 4 + 4))
    rows_fit = proj_budget // (2 * (dim * 4 + 4))
    if rows_fit >= N:
        tile_p, grid_p = N, 1                     # single full block
    else:
        tile_p = int(max(128, (min(2048, rows_fit) // 128) * 128))
        grid_p = pl.cdiv(N, tile_p)

    u = pl.pallas_call(
        _project_kernel,
        out_shape=jax.ShapeDtypeStruct((1, N), jnp.float32),
        grid_spec=pltpu.PrefetchScalarGridSpec(
            num_scalar_prefetch=0,
            grid=(grid_p,),
            in_specs=[pl.BlockSpec((tile_p, dim), lambda i: (i, 0)),
                      pl.BlockSpec((1, dim), lambda i: (0, 0)),
                      pl.BlockSpec((1, dim), lambda i: (0, 0))],
            out_specs=pl.BlockSpec((1, tile_p), lambda i: (0, i))),
        compiler_params=pltpu.CompilerParams(
            dimension_semantics=("parallel",),
            vmem_limit_bytes=vmem_limit),
    )(x2d, v, shift)

    # ---- pass 3: rescale + threshold + label select (tiny, single block) ----
    out = pl.pallas_call(
        functools.partial(_label_kernel, threshold=float(threshold),
                          bg_class=int(bg_class), use_ge=(compare_fn == "ge")),
        out_shape=jax.ShapeDtypeStruct((1, N), jnp.int32),
        in_specs=[pl.BlockSpec(memory_space=pltpu.MemorySpace.VMEM),
                  pl.BlockSpec(memory_space=pltpu.MemorySpace.VMEM)],
        out_specs=pl.BlockSpec(memory_space=pltpu.MemorySpace.VMEM),
    )(u, y_row)

    return out.reshape(B, H, W)


if __name__ == "__main__":
    key = jax.random.PRNGKey(0)
    kx, ky = jax.random.split(key)

    B, n_patches, dim = 2, 16, 32        # H = W = 4
    x = jax.random.normal(kx, (B, n_patches, dim), jnp.float32)
    y = jax.random.randint(ky, (B,), 0, 10, jnp.int32)

    labels = pca_forward(x, y, compare_fn="le", threshold=0.5,
                         n_components=1, bg_class=200)
    jax.block_until_ready(labels)

    assert labels.shape == (B, 4, 4)
    assert labels.dtype == jnp.int32
    print("KERNEL_OK")
</pallas_src>

<mosaic_0001>
module attributes {stable_mosaic.version = 11 : i64} {
  func.func @_partial_gram_kernel(%arg0: i32, %arg1: i32, %arg2: memref<16x32xf32, #tpu.memory_space<vmem>>, %arg3: memref<1x32xf32, #tpu.memory_space<vmem>>, %arg4: memref<1x32x32xf32, #tpu.memory_space<vmem>>, %arg5: memref<1x1x32xf32, #tpu.memory_space<vmem>>) attributes {dimension_semantics = [#tpu.dimension_semantics<parallel>, #tpu.dimension_semantics<arbitrary>], iteration_bounds = array<i64: 2, 1>, scalar_prefetch = 0 : i64, scratch_operands = 0 : i64, tpu.core_type = #tpu.core_type<tc>, window_params = [{transform_indices = @transform_0, window_bounds = array<i64: 16, 32>}, {pipeline_mode = #tpu.pipeline_mode<synchronous>, transform_indices = @transform_1, window_bounds = array<i64: 1, 32>}, {transform_indices = @transform_2, window_bounds = array<i64: 1, 32, 32>}, {transform_indices = @transform_3, window_bounds = array<i64: 1, 1, 32>}]} {
    %c0_i32 = arith.constant 0 : i32
    %0 = arith.cmpi eq, %arg1, %c0_i32 : i32
    %1 = arith.extui %0 : i1 to i32
    %c0_i32_0 = arith.constant 0 : i32
    %2 = arith.cmpi ne, %1, %c0_i32_0 : i32
    scf.if %2 {
      %cst_18 = arith.constant 0.000000e+00 : f32
      %35 = vector.broadcast %cst_18 : f32 to vector<32x32xf32>
      %c0_19 = arith.constant 0 : index
      %c0_20 = arith.constant 0 : index
      %c0_21 = arith.constant 0 : index
      %36 = vector.load %arg4[%c0_19, %c0_20, %c0_21] : memref<1x32x32xf32, #tpu.memory_space<vmem>>, vector<1x32x32xf32>
      %37 = vector.shape_cast %36 : vector<1x32x32xf32> to vector<32x32xf32>
      %38 = vector.shape_cast %35 : vector<32x32xf32> to vector<1x32x32xf32>
      tpu.vector_store %arg4[%c0_19, %c0_20, %c0_21], %38 {strides = array<i32>} : memref<1x32x32xf32, #tpu.memory_space<vmem>>, vector<1x32x32xf32>,
      %cst_22 = arith.constant 0.000000e+00 : f32
      %39 = vector.broadcast %cst_22 : f32 to vector<1x32xf32>
      %c0_23 = arith.constant 0 : index
      %c0_24 = arith.constant 0 : index
      %c0_25 = arith.constant 0 : index
      %40 = vector.load %arg5[%c0_23, %c0_24, %c0_25] : memref<1x1x32xf32, #tpu.memory_space<vmem>>, vector<1x1x32xf32>
      %41 = vector.shape_cast %40 : vector<1x1x32xf32> to vector<1x32xf32>
      %42 = vector.shape_cast %39 : vector<1x32xf32> to vector<1x1x32xf32>
      tpu.vector_store %arg5[%c0_23, %c0_24, %c0_25], %42 {strides = array<i32>} : memref<1x1x32xf32, #tpu.memory_space<vmem>>, vector<1x1x32xf32>,
    } else {
    }
    %c1_i32 = arith.constant 1 : i32
    %3 = arith.muli %arg0, %c1_i32 : i32
    %4 = arith.addi %3, %arg1 : i32
    %c16_i32 = arith.constant 16 : i32
    %5 = arith.muli %4, %c16_i32 : i32
    %6 = tpu.iota {dimensions = array<i32: 0>} : vector<16x1xi32>
    %7 = vector.broadcast %5 : i32 to vector<16x1xi32>
    %8 = arith.addi %6, %7 : vector<16x1xi32>
    %c32_i32 = arith.constant 32 : i32
    %9 = vector.broadcast %c32_i32 : i32 to vector<16x1xi32>
    %10 = arith.cmpi slt, %8, %9 : vector<16x1xi32>
    %c0 = arith.constant 0 : index
    %c0_1 = arith.constant 0 : index
    %11 = vector.load %arg2[%c0, %c0_1] : memref<16x32xf32, #tpu.memory_space<vmem>>, vector<16x32xf32>
    %c0_2 = arith.constant 0 : index
    %c0_3 = arith.constant 0 : index
    %12 = vector.load %arg3[%c0_2, %c0_3] : memref<1x32xf32, #tpu.memory_space<vmem>>, vector<1x32xf32>
    %13 = vector.broadcast %12 : vector<1x32xf32> to vector<16x32xf32>
    %14 = arith.subf %11, %13 : vector<16x32xf32>
    %cst = arith.constant 0.000000e+00 : f32
    %15 = vector.shape_cast %10 : vector<16x1xi1> to vector<16x1xi1>
    %16 = vector.broadcast %15 : vector<16x1xi1> to vector<16x32xi1>
    %17 = vector.broadcast %cst : f32 to vector<16x32xf32>
    %18 = arith.select %16, %14, %17 : vector<16x32xi1>, vector<16x32xf32>
    %19 = arith.truncf %18 : vector<16x32xf32> to vector<16x32xbf16>
    %c0_4 = arith.constant 0 : index
    %c0_5 = arith.constant 0 : index
    %c0_6 = arith.constant 0 : index
    %20 = vector.load %arg4[%c0_4, %c0_5, %c0_6] : memref<1x32x32xf32, #tpu.memory_space<vmem>>, vector<1x32x32xf32>
    %21 = vector.shape_cast %20 : vector<1x32x32xf32> to vector<32x32xf32>
    %cst_7 = arith.constant dense<0.000000e+00> : vector<32x32xf32>
    %22 = tpu.matmul %19, %19, %cst_7 {dimension_numbers = #tpu.dot_dimension_numbers<[0], [0], [1], [1], [0, 1, 1, 1], [], []>} : vector<16x32xbf16>, vector<16x32xbf16>, vector<32x32xf32> -> vector<32x32xf32>
    %23 = arith.addf %21, %22 : vector<32x32xf32>
    %c0_8 = arith.constant 0 : index
    %c0_9 = arith.constant 0 : index
    %c0_10 = arith.constant 0 : index
    %24 = vector.load %arg4[%c0_8, %c0_9, %c0_10] : memref<1x32x32xf32, #tpu.memory_space<vmem>>, vector<1x32x32xf32>
    %25 = vector.shape_cast %24 : vector<1x32x32xf32> to vector<32x32xf32>
    %26 = vector.shape_cast %23 : vector<32x32xf32> to vector<1x32x32xf32>
    tpu.vector_store %arg4[%c0_8, %c0_9, %c0_10], %26 {strides = array<i32>} : memref<1x32x32xf32, #tpu.memory_space<vmem>>, vector<1x32x32xf32>,
    %c0_11 = arith.constant 0 : index
    %c0_12 = arith.constant 0 : index
    %c0_13 = arith.constant 0 : index
    %27 = vector.load %arg5[%c0_11, %c0_12, %c0_13] : memref<1x1x32xf32, #tpu.memory_space<vmem>>, vector<1x1x32xf32>
    %28 = vector.shape_cast %27 : vector<1x1x32xf32> to vector<1x32xf32>
    %cst_14 = arith.constant dense<0.000000e+00> : vector<32xf32>
    %29 = vector.multi_reduction <add>, %18, %cst_14 [0] : vector<16x32xf32> to vector<32xf32>
    %30 = vector.shape_cast %29 : vector<32xf32> to vector<1x32xf32>
    %31 = arith.addf %28, %30 : vector<1x32xf32>
    %c0_15 = arith.constant 0 : index
    %c0_16 = arith.constant 0 : index
    %c0_17 = arith.constant 0 : index
    %32 = vector.load %arg5[%c0_15, %c0_16, %c0_17] : memref<1x1x32xf32, #tpu.memory_space<vmem>>, vector<1x1x32xf32>
    %33 = vector.shape_cast %32 : vector<1x1x32xf32> to vector<1x32xf32>
    %34 = vector.shape_cast %31 : vector<1x32xf32> to vector<1x1x32xf32>
    tpu.vector_store %arg5[%c0_15, %c0_16, %c0_17], %34 {strides = array<i32>} : memref<1x1x32xf32, #tpu.memory_space<vmem>>, vector<1x1x32xf32>,
    return
  }
  func.func @transform_0(%arg0: i32, %arg1: i32) -> (i32, i32) {
    %c1_i32 = arith.constant 1 : i32
    %0 = arith.muli %arg0, %c1_i32 : i32
    %1 = arith.addi %0, %arg1 : i32
    %c1_i32_0 = arith.constant 1 : i32
    %2 = arith.minsi %1, %c1_i32_0 : i32
    %c0_i32 = arith.constant 0 : i32
    %c0_i32_1 = arith.constant 0 : i32
    return %2, %c0_i32 : i32, i32
  }
  func.func @transform_1(%arg0: i32, %arg1: i32) -> (i32, i32) {
    %c0_i32 = arith.constant 0 : i32
    %c0_i32_0 = arith.constant 0 : i32
    %c0_i32_1 = arith.constant 0 : i32
    return %c0_i32, %c0_i32_0 : i32, i32
  }
  func.func @transform_2(%arg0: i32, %arg1: i32) -> (i32, i32, i32) {
    %c0_i32 = arith.constant 0 : i32
    %c0_i32_0 = arith.constant 0 : i32
    %c0_i32_1 = arith.constant 0 : i32
    return %arg0, %c0_i32, %c0_i32_0 : i32, i32, i32
  }
  func.func @transform_3(%arg0: i32, %arg1: i32) -> (i32, i32, i32) {
    %c0_i32 = arith.constant 0 : i32
    %c0_i32_0 = arith.constant 0 : i32
    %c0_i32_1 = arith.constant 0 : i32
    return %arg0, %c0_i32, %c0_i32_0 : i32, i32, i32
  }
}

</mosaic_0001>

<bundles_post_ra>
// kernel: tpu_custom_call.1
= control target key start
LH: loop header
LB: loop body
LE: loop exit
PB: predicated region body
PF: predicated region fallthrough
CT: control target
= control target key end

     0   :  { %9 = vsyncpa [#allocation3], 0  ;;  %s1055_s0 = inlined_call_operand.hbm [shape: f32[32,32], index: 0, kind: input, shape index: {}]   ;;  %s1056_s1 = inlined_call_operand.vmem [shape: f32[1,32], index: 1, kind: input, shape index: {}]   ;;  %s1057_s2 = inlined_call_operand.hbm [shape: f32[2,32,32], index: 2, kind: output, shape index: {0}]   ;;  %s1058_s3 = inlined_call_operand.hbm [shape: f32[2,1,32], index: 3, kind: output, shape index: {1}]  }
   0x1   :  { %11 = vsyncpa [#allocation3 + $0x1], 0 }
   0x2   :  { %12 = vsyncpa [#allocation4], 0 }
   0x3   :  { %14 = vsyncpa [#allocation4 + $0x1], 0 }
   0x4   :  { %15 = vsyncpa [#allocation7], 0 }
   0x5   :  { %17 = vsyncpa [#allocation7 + $0x1], 0  ;;  %s825_s12 = smov 0   ;;  %s827_s13 = smov 0  }
   0x6   :  { %s829_s14 = smov 0   ;;  %s831_s15 = smov 0  }
   0x7   :  { %s833_s16 = smov 0   ;;  %s835_s17 = smov 0  }
   0x8   :  { %s837_s18 = smov 0   ;;  %s839_s19 = smov 0  }
   0x9   :  { %s841_s20 = smov 0  }
   0xa LB: > { %s502_s21 = sadd.s32 4294967295, %s795_s20   ;;  %s503_s22 = sadd.s32 4294967294, %s795_s20   ;;  %s795_s20 = sphi %s841_s20, %s23_s20   ;;  %s791_s19 = sphi %s839_s19, %s1075_s19   ;;  %s787_s18 = sphi %s837_s18, %s1074_s18   ;;  %s783_s17 = sphi %s835_s17, %s1073_s17   ;;  %s779_s16 = sphi %s833_s16, %s1072_s16   ;;  %s775_s15 = sphi %s831_s15, %s1071_s15   ;;  %s771_s14 = sphi %s829_s14, %s1070_s14   ;;  %s767_s13 = sphi %s827_s13, %s1069_s13   ;;  %s763_s12 = sphi %s825_s12, %s1068_s12  }
   0xb   : > { %s35_s23 = sadd.s32 1, %s791_s19  ;;  %p40_p0 = scmp.lt.s32.totalorder %s791_s19, 1 }
   0xc   : > { %p37_p1 = scmp.ge.s32.totalorder %s35_s23, 2  ;;  %s48_s24 = sadd.s32 1, %s783_s17 }
   0xd   : > { %s874_s25 = scalar_select %p40_p0, %s791_s19, 1 }
   0xe   : > { %s1077_s23 = smov (%p37_p1, %s35_s23), 0  ;;  %p55_p2 = scmp.ne.s32.totalorder %s783_s17, %s779_s16 }
   0xf   : > { %1060 = sst [smem:[#allocation11_spill]] %s1077_s23  ;;  %p56_p3 = scmp.eq.s32.totalorder %s795_s20, 0 }
  0x10   : > { %p43_p4 = scmp.lt.s32.totalorder %s1077_s23, 1  ;;  %p61_p5 = scmp.ne.s32.totalorder %s779_s16, %s775_s15 }
  0x11   : > { %p883_p6 = por %p56_p3, %p55_p2  ;;  %p62_p7 = scmp.eq.s32.totalorder %s502_s21, 0 }
  0x12   : > { %s44_s27 = scalar_select %p43_p4, %s1077_s23, 1 }
  0x13   : > { %p888_p8 = por %p62_p7, %p61_p5  ;;  %s92_s29 = ssub.s32 %s791_s19, %s1077_s23 }
  0x14   : > { %s45_s30 = ssub.s32 %s874_s25, %s44_s27  ;;  %p93_p9 = scmp.eq.s32.totalorder %s92_s29, 0 }
  0x15   : > { %p46_p10 = scmp.eq.s32.totalorder %s45_s30, 0  ;;  %s95_s4 = sadd.s32 1, %s771_s14 }
  0x16   : > { %s897_s5 = scalar_select %p93_p9, %s771_s14, %s95_s4  }
  0x17   : > { %s900_s6 = scalar_select %p46_p10, %s783_s17, %s48_s24  }
  0x18   : > { %p105_p11 = scmp.ne.s32.totalorder %s771_s14, %s767_s13  ;;  %p106_p12 = scmp.eq.s32.totalorder %s502_s21, 1 }
  0x19   : > { %p111_p13 = scmp.ne.s32.totalorder %s767_s13, %s763_s12  ;;  %p112_p0 = scmp.eq.s32.totalorder %s503_s22, 1 }
  0x1a   : > { %p906_p1 = por %p106_p12, %p105_p11  ;;  %p553_p4 = scmp.lt.s32.totalorder %s795_s20, 2 }
  0x1b   : > { %p911_p3 = por %p112_p0, %p111_p13  ;;  %s161_s9 = sand.u32 1, %s783_s17  }
  0x1c   : > { %s525_s10 = sshll.u32 %s874_s25, 8  ;;  %s506_s11 = sshll.u32 %s161_s9, 4 }
  0x1d   : > { %s174_s27 = scalar_lea.hbm %s1055_s0, %s525_s10  ;;  %s165_s21 = scalar_lea.vmem [#allocation2], %s506_s11 }
  0x1e   : > { %s175_s29 = sshll.u32 %s165_s21, 4  ;;  %p923_p5 = pnand %p553_p4, %p883_p6  ;;  %s176_s29 = int_to_ptr.vmem [resolvable:$true] %s175_s29 }
  0x1f   : > { %s162_s30 = scalar_lea.sflag [#allocation3], %s161_s9  ;;  %s646_s4 = scalar_lea.vmem %s176_s29, 256 }
  0x20   : > { %p635_p7 = pneg %p923_p5  ;;  %p647_p9 = scmp.ne.s32.totalorder %s176_s29, %s646_s4 }
  0x21   : > { %s797_s25 = smov [#allocation2]  }
  0x22   : > { %p649_p10 = pnand %p647_p9, %p635_p7  ;;  %s651_s23 = sshll.u32 %s797_s25, 4  ;;  %s652_s23 = int_to_ptr.vmem [resolvable:$false] %s651_s23 }
  0x23   : > { %s653_s10 = scalar_lea.vmem %s652_s23, 512  ;;  %p654_p12 = scmp.lt.s32.totalorder %s176_s29, %s652_s23 }
  0x24   : > { %p650_p11 = pneg %p649_p10  ;;  %p655_p13 = scmp.lt.s32.totalorder %s653_s10, %s646_s4 }
  0x26   : > { %p656_p0 = por %p655_p13, %p654_p12 }
  0x28   : > { %p657_p6 = pnand %p656_p0, %p650_p11 }
  0x2a   : > { %660 = shalt.err (!%p657_p6)
}
  0x2b   : > { %s798_s26 = smov 128   ;;  %s799_s9 = smov 8  }
  0x2c   : > { %545 = dma.hbm_to_vmem [thread:$0]  (!%p923_p5), %s174_s27, 256, %s176_s29, %s162_s30, %s798_s26, %s798_s26, %s799_s9  }
  0x2d   : > { %p509_p4 = scmp.ge.s32.totalorder %s795_s20, 1  ;;  %p183_p2 = scmp.lt.s32.totalorder %s795_s20, 3 }
  0x2f   : > { %p184_p7 = pnand %p509_p4, %p183_p2 }
  0x30   : > { %s189_s11 = sand.u32 (!%p184_p7), 1, %s779_s16  }
  0x31   : > { %187 = sbr.rel (%p184_p7) target bundleno = 385 (0x181), region = 28  ;;  %s510_s15 = sshll.u32 (!%p184_p7), %s189_s11, 4 }
  0x32   : > { %s190_s23 = scalar_lea.sflag (!%p184_p7), [#allocation3], %s189_s11  ;;  %s193_s24 = scalar_lea.vmem (!%p184_p7), [#allocation2], %s510_s15 }
  0x36   : > { %750 = dma.done.wait (%p888_p8), %s190_s23, 256  }
  0x37   : > { %752 = vsyncadd (%p888_p8), %s190_s23, 4294967040  ;;  %vm229_vm0 = vcmask 261120   ;;  %s512_s27 = sshll.u32 %s787_s18, 4  ;;  %v238_v0 = vlaneseq  ;;  %s940_s21 = sand.u32 1, %s767_s13   ;;  %v800_v3 = vmov 0.0   ;;  %v246_v7 = vld [vmem:[%s193_s24] sm:$0xff] }
  0x38   : > { %v241_v1 = vstv %s512_s27  ;;  %s511_s29 = sshll.u32 %s940_s21, 5  ;;  %v247_v8 = vld [vmem:[%s193_s24 + $0x8] sm:$0xff]  ;;  %v513_v9 = vld [vmem:[%s1056_s1] ss:$0 sm:$0xff]  ;;  %vm284_vm4 = vcmask 130048   ;;  %vm234_vm5 = vcmask 253952   ;;  %s394_s26 = scalar_lea.hbm %s1058_s3, %s512_s27 }
  0x39   : > { %v239_v2 = vshrl.u32 %v238_v0, 7  ;;  %s945_s22 = scalar_lea.vmem [#allocation5], %s511_s29  ;;  %v255_v10 = vsub.f32 %v246_v7, %v513_v9  ;;  %v256_v11 = vsub.f32 %v247_v8, %v513_v9  ;;  %s219_s4 = scalar_lea.vmem [#allocation6], %s940_s21 }
  0x3a   : > { %232 = vst.msk [vmem:[%s945_s22 + $0x10] sm:$0xff] %vm229_vm0, %v800_v3  ;;  %230 = vst.msk [vmem:[%s945_s22] sm:$0xff] %vm229_vm0, %v800_v3  ;;  %s396_s9 = sshll.u32 %s219_s4, 4  ;;  %s368_s11 = scalar_lea.sflag [#allocation7], %s940_s21  ;;  %s397_s9 = int_to_ptr.vmem [resolvable:$true] %s396_s9 }
  0x3b   : > { %231 = vst.msk [vmem:[%s945_s22 + $0x8] sm:$0xff] %vm229_vm0, %v800_v3  ;;  %233 = vst.msk [vmem:[%s945_s22 + $0x18] sm:$0xff] %vm229_vm0, %v800_v3  ;;  %v240_v4 = vadd.s32 8, %v239_v2  ;;  %v242_v5 = vadd.s32 %v241_v1, %v239_v2  ;;  %v515_v14 = vpack.c.bf16 %v256_v11, %v255_v10  ;;  %s661_s15 = scalar_lea.vmem %s397_s9, 16  ;;  %s801_s23 = smov [#allocation6]  }
  0x3c   : > { %235 = vst.msk [vmem:[%s219_s4] sm:$0x1] %vm234_vm5, %v800_v3  ;;  %p662_p8 = scmp.ne.s32.totalorder %s397_s9, %s661_s15  ;;  %s665_s24 = sshll.u32 %s801_s23, 4  ;;  %s666_s24 = int_to_ptr.vmem [resolvable:$false] %s665_s24 }
  0x3d   : > { %v243_v6 = vadd.s32 %v241_v1, %v240_v4  ;;  %vm244_vm1 = vcmp.lt.s32.totalorder %v242_v5, 32  ;;  %s667_s29 = scalar_lea.vmem %s666_s24, 32  ;;  %p668_p9 = scmp.lt.s32.totalorder %s397_s9, %s666_s24 }
  0x3e   : > { %v261_v12 = vsel %vm244_vm1, %v255_v10, 0.0  ;;  %p663_p2 = pnand %p662_p8, %p906_p1  ;;  %p669_p10 = scmp.lt.s32.totalorder %s667_s29, %s661_s15 }
  0x3f   : > { %vm245_vm2 = vcmp.lt.s32.totalorder %v243_v6, 32  ;;  %v350_v16 = vsel %vm229_vm0, %v261_v12, 0.0 }
  0x40   : > { %vm514_vm3 = vmpackc.low %vm245_vm2, %vm244_vm1  ;;  %v262_v13 = vsel %vm245_vm2, %v256_v11, 0.0  ;;  %p664_p5 = pneg %p663_p2  ;;  %p670_p11 = por %p669_p10, %p668_p9 }
  0x41   : > { %v263_v15 = vpack.c.bf16 %v262_v13, %v261_v12  ;;  %v351_v17 = vsel %vm229_vm0, %v262_v13, 0.0  ;;  %530 = vmatprep.subr.msk.bf16.mxu0 %vm514_vm3, %v515_v14 }
  0x42   : > { %v352_v18 = vadd.f32 %v351_v17, %v350_v16  ;;  %531 = vmatpush3.bf16.msk.msra.mxu0 %vm514_vm3, %v515_v14  ;;  %p671_p12 = pnand %p670_p11, %p664_p5 }
  0x43   : > { %268 = vxpose.xlu0.c.b16.start.end [1/1] (short) (narrow) %v263_v15, 32  ;;  %v349_v27 = vld [vmem:[%s219_s4] sm:$0x1] }
  0x44   : > { %v353_v21 = vrot.slane %v352_v18, 4 }
  0x46   : > { %v354_v22 = vadd.f32 %v353_v21, %v352_v18 }
  0x48   : > { %v355_v23 = vrot.slane %v354_v22, 2 }
  0x4a   : > { %v356_v24 = vadd.f32 %v355_v23, %v354_v22 }
  0x4c   : > { %v357_v25 = vrot.slane %v356_v24, 1 }
  0x4e   : > { %v358_v26 = vadd.f32 %v357_v25, %v356_v24 }
  0x50   : > { %v359_v28 = vadd.f32 %v358_v26, %v349_v27 }
  0x52   : > { %361 = vst.msk [vmem:[%s219_s4] sm:$0x1] %vm234_vm5, %v359_v28 }
  0xa5   : > { %v276_v19 = vpop.trf.xlu0 }
  0xa6   : > { %532 = vmatprep.mubr.msk.bf16.mxu0 %vm284_vm4, %v276_v19 }
  0xa9   : > { %v277_v20 = vpop.trf.xlu0 }
  0xaa   : > { %533 = vmatmul.mubr.msk.bf16.vlgmr.msra.gmra.mxu0 %vm284_vm4, %v277_v20 }
  0xab   : > { %674 = shalt.err (!%p671_p12)
}
  0xac   : > { %s675_s28 = scalar_lea.hbm %s394_s26, 16  ;;  %s679_s4 = scalar_lea.hbm %s1058_s3, 32 }
  0xad   : > { %p676_p13 = scmp.ne.s32.totalorder %s394_s26, %s675_s28  ;;  %p680_p4 = scmp.lt.s32.totalorder %s394_s26, %s1058_s3 }
  0xae   : > { %p681_p7 = scmp.lt.s32.totalorder %s679_s4, %s675_s28 }
  0xaf   : > { %p677_p0 = pnand %p676_p13, %p906_p1 }
  0xb0   : > { %p682_p8 = por %p681_p7, %p680_p4 }
  0xb1   : > { %p678_p6 = pneg %p677_p0 }
  0xb3   : > { %p683_p2 = pnand %p682_p8, %p678_p6 }
  0xb5   : > { %686 = shalt.err (!%p683_p2)
}
  0xb6   : > { %539 = dma.vmem_to_hbm [thread:$0]  (%p906_p1), %s397_s9, 16, %s394_s26, %s368_s11   ;;  %v266_v29 = vld [vmem:[%s945_s22 + $0x10] sm:$0xff]  ;;  %v264_v31 = vld [vmem:[%s945_s22] sm:$0xff]  ;;  %v267_v34 = vld [vmem:[%s945_s22 + $0x18] sm:$0xff] }
  0xb7   : > { %s526_s15 = sshll.u32 %s787_s18, 9  ;;  %s380_s23 = sshll.u32 %s945_s22, 4  ;;  %v265_v37 = vld [vmem:[%s945_s22 + $0x8] sm:$0xff]  ;;  %s994_s23 = int_to_ptr.vmem [resolvable:$true] %s380_s23 }
  0xb8   : > { %s992_s11 = scalar_lea.hbm %s1057_s2, %s526_s15  ;;  %s363_s18 = scalar_lea.sflag [#allocation4], %s940_s21 }
  0xb9   : > { %s687_s24 = scalar_lea.vmem %s994_s23, 512  ;;  %s802_s29 = smov [#allocation5]  }
  0xba   : > { %p688_p5 = scmp.ne.s32.totalorder %s994_s23, %s687_s24  ;;  %s691_s28 = sshll.u32 %s802_s29, 4  ;;  %s692_s28 = int_to_ptr.vmem [resolvable:$false] %s691_s28 }
  0xbb   : > { %s693_s27 = scalar_lea.vmem %s692_s28, 1024  ;;  %p694_p11 = scmp.lt.s32.totalorder %s994_s23, %s692_s28 }
  0xbc   : > { %p689_p9 = pnand %p688_p5, %p906_p1  ;;  %p695_p12 = scmp.lt.s32.totalorder %s693_s27, %s687_s24 }
  0xbe   : > { %p690_p10 = pneg %p689_p9  ;;  %p696_p13 = por %p695_p12, %p694_p11 }
  0xc0   : > { %p697_p0 = pnand %p696_p13, %p690_p10 }
 0x16a   : > { %v534_v30 = vpop.f32.mrf.mxu0 }
 0x16b   : > { %v342_v32 = vadd.f32 %v534_v30, %v266_v29 }
 0x16c   : > { %v325_v33 = vpop.f32.mrf.mxu0 }
 0x16d   : > { %347 = vst.msk [vmem:[%s945_s22 + $0x10] sm:$0xff] %vm229_vm0, %v342_v32  ;;  %v340_v35 = vadd.f32 %v325_v33, %v264_v31 }
 0x16e   : > { %v535_v36 = vpop.f32.mrf.mxu0 }
 0x16f   : > { %345 = vst.msk [vmem:[%s945_s22] sm:$0xff] %vm229_vm0, %v340_v35  ;;  %v343_v38 = vadd.f32 %v535_v36, %v267_v34 }
 0x170   : > { %v328_v39 = vpop.f32.mrf.mxu0 }
 0x171   : > { %348 = vst.msk [vmem:[%s945_s22 + $0x18] sm:$0xff] %vm229_vm0, %v343_v38  ;;  %v341_v40 = vadd.f32 %v328_v39, %v265_v37 }
 0x173   : > { %346 = vst.msk [vmem:[%s945_s22 + $0x8] sm:$0xff] %vm229_vm0, %v341_v40 }
 0x174   : > { %700 = shalt.err (!%p697_p0)
}
 0x175   : > { %s701_s22 = scalar_lea.hbm %s992_s11, 512  ;;  %s705_s25 = scalar_lea.hbm %s1057_s2, 1024 }
 0x176   : > { %p702_p6 = scmp.ne.s32.totalorder %s992_s11, %s701_s22  ;;  %p706_p8 = scmp.lt.s32.totalorder %s992_s11, %s1057_s2 }
 0x177   : > { %p707_p2 = scmp.lt.s32.totalorder %s705_s25, %s701_s22 }
 0x178   : > { %p703_p4 = pnand %p702_p6, %p906_p1 }
 0x179   : > { %p708_p5 = por %p707_p2, %p706_p8 }
 0x17a   : > { %p704_p7 = pneg %p703_p4 }
 0x17c   : > { %p709_p9 = pnand %p708_p5, %p704_p7 }
 0x17e   : > { %712 = shalt.err (!%p709_p9)
}
 0x17f   : > { %s803_s26 = smov 128   ;;  %s804_s9 = smov 8  }
 0x180   : > { %538 = dma.vmem_to_hbm [thread:$0]  (%p906_p1), %s994_s23, 512, %s992_s11, %s363_s18, %s803_s26, %s803_s26, %s804_s9  }
 0x181 PF: > { %s408_s24 = sand.u32 1, %s763_s12   ;;  %p1066_p10 = scmp.ge.s32.totalorder %s795_s20, 2 }
 0x182   : > { %s409_s29 = scalar_lea.sflag [#allocation4], %s408_s24 }
 0x183   : > { %p547_p11 = pnand %p1066_p10, %p911_p3 }
 0x185   : > { %p548_p12 = pneg %p547_p11 }
 0x187   : > { %754 = dma.done.wait (%p548_p12), %s409_s29, 512  }
 0x188   : > { %756 = vsyncadd (%p548_p12), %s409_s29, 4294966784  ;;  %s418_s28 = scalar_lea.sflag [#allocation7], %s408_s24 }
 0x189   : > { %758 = dma.done.wait (%p548_p12), %s418_s28, 16  }
 0x18a   : > { %760 = vsyncadd (%p548_p12), %s418_s28, 4294967280  ;;  %s23_s20 = sadd.s32 1, %s795_s20   ;;  %s1067_s7 = sld [smem:[#allocation11_spill]] }
 0x18b   : > { %p20_p13 = scmp.ge.s32.totalorder %s23_s20, 4   ;;  %s1068_s12 = smov %s767_s13 }
 0x18c   : > { %s1069_s13 = smov %s771_s14  ;;  %s1070_s14 = smov %s897_s5 }
 0x18d   : > { %s1071_s15 = smov %s779_s16  ;;  %s1072_s16 = smov %s783_s17 }
 0x18e   : > { %s1073_s17 = smov %s900_s6  ;;  %s1074_s18 = smov %s791_s19 }
 0x18f   :  { %22 = sbr.rel (!%p20_p13) target bundleno = 10 (0xa), region = 94 }
 0x190   : > { %s1075_s19 = smov %s1067_s7 }
 0x194   :  { %422 = vsyncpa [#allocation3], 1 }
 0x195   :  { %424 = vsyncpa [#allocation3 + $0x1], 1 }
 0x196   :  { %425 = vsyncpa [#allocation4], 1 }
 0x197   :  { %427 = vsyncpa [#allocation4 + $0x1], 1 }
 0x198   :  { %428 = vsyncpa [#allocation7], 1 }
 0x199   :  { %430 = vsyncpa [#allocation7 + $0x1], 1 }

</bundles_post_ra>
